<compile_context>
chip_gen: v7x
topology: tpu7x:2x2x1
jax: 0.10.0
libtpu: 0.0.40
codegen_flags: <defaults>
</compile_context>

<pallas_src>
import functools

import jax
import jax.numpy as jnp
from jax.experimental import pallas as pl
from jax.experimental.pallas import tpu as pltpu


def _round_up(x, m):
    return (x + m - 1) // m * m


def _pad2d(a, rows, cols):
    r, c = a.shape
    if r == rows and c == cols:
        return a
    return jnp.pad(a, ((0, rows - r), (0, cols - c)))


# ---------------------------------------------------------------------------
# VMEM-aware tile selection
# ---------------------------------------------------------------------------

_MAX_TILE_K = 2048     # streamed-K fallback weight-tile cap (lane-aligned)
_MAX_TILE_N = 2048


def _vmem_capacity_bytes():
    """Physical VMEM per core (128 MiB v5e/v6e, 64 MiB v7x); safe fallback."""
    try:
        info = pltpu.get_tpu_info()
        cap = int(getattr(info, "vmem_capacity_bytes", 0))
        if cap > 0:
            return cap
    except Exception:
        pass
    return 64 * 1024 * 1024        # conservative (v7x-sized) fallback


def _vmem_fits(R, k_pad, tk, tn, budget, with_acc):
    x_b = 2 * R * k_pad * 2        # resident bf16 activations (count 2 buffers)
    w_b = 2 * tk * tn * 2          # double-buffered bf16 weight tile
    b_b = 2 * tn * 4               # f32 bias tile
    o_b = 2 * R * tn * 2           # bf16 output tile
    a_b = R * tn * 4 if with_acc else 0
    return x_b + w_b + b_b + o_b + a_b <= budget


def _tile_candidates(dim_pad, cap):
    """Lane-aligned divisors of dim_pad, largest first, capped at `cap`."""
    cands = []
    t = min(cap, dim_pad)
    t -= t % 128
    while t >= 128:
        if dim_pad % t == 0:
            cands.append(t)
        t -= 128
    return cands


def _select_tiles(R, k_pad, n_pad, budget):
    # Megacore guard (v7x has 2 TCs): prefer >= 2 N tiles whenever n_pad allows.
    n_cap = _MAX_TILE_N if n_pad < 256 else max(128, min(_MAX_TILE_N, n_pad // 2))

    # 1) Full-K weight slabs: no reduction grid axis, no accumulator scratch.
    for tn in _tile_candidates(n_pad, n_cap):
        if _vmem_fits(R, k_pad, k_pad, tn, budget, with_acc=False):
            return k_pad, tn

    # 2) Streamed-K fallback: resident activations + f32 accumulator.
    for tk in _tile_candidates(k_pad, _MAX_TILE_K):
        for tn in _tile_candidates(n_pad, n_cap):
            if _vmem_fits(R, k_pad, tk, tn, budget, with_acc=True):
                return tk, tn

    # 3) Last resort: smallest lane-aligned tiles.
    return 128, 128


# ---------------------------------------------------------------------------
# Kernels
# ---------------------------------------------------------------------------

def _linear_full_k_kernel(x_ref, w_ref, b_ref, o_ref, *, apply_tanh):
    """Full-K step: o[:, jTN:(j+1)TN] = act(x @ W[:, j] + b[j]).

    x: [R, K] bf16 (resident)   w: [K, TN] bf16   b: [1, TN] f32   o: [R, TN] bf16
    """
    y = jnp.dot(x_ref[...], w_ref[...], preferred_element_type=jnp.float32)
    y = y + b_ref[...]
    if apply_tanh:
        y = jnp.tanh(y)                        # f32 tanh (EUP)
    o_ref[...] = y.astype(o_ref.dtype)


def _linear_streamed_k_kernel(x_ref, w_ref, b_ref, o_ref, acc_ref, *, apply_tanh):
    """Streamed-K step (j, k): acc += x[k] @ W[k, j]; epilogue on last k.

    x: [k_steps, R, TK] bf16 (resident; cheap leading-axis dynamic index)
    w: [TK, TN] bf16   b: [1, TN] f32   o: [R, TN] bf16   acc: [R, TN] f32
    """
    k = pl.program_id(1)

    @pl.when(k == 0)
    def _():
        acc_ref[...] = jnp.zeros_like(acc_ref)

    acc_ref[...] += jnp.dot(x_ref[k], w_ref[...],
                            preferred_element_type=jnp.float32)

    @pl.when(k == pl.num_programs(1) - 1)
    def _():
        y = acc_ref[...] + b_ref[...]          # bias in f32
        if apply_tanh:
            y = jnp.tanh(y)                    # tanh in f32 (EUP)
        o_ref[...] = y.astype(o_ref.dtype)


# ---------------------------------------------------------------------------
# Tiled linear wrapper
# ---------------------------------------------------------------------------

def _tiled_linear(x, w, b, *, apply_tanh, out_dtype=jnp.bfloat16,
                  force_tiles=None):
    """y = act(x @ w + b) with a weight-streaming Pallas matmul.

    x: [R, K_pad] bf16 (rows already sublane-padded), w: [K_pad, N_pad] bf16
    (pre-padded/cast at parameter-prep time), b: [1, N_pad] f32.
    Returns [R, N_pad] in out_dtype (caller slices off padding).
    """
    R, k_pad = x.shape
    kw, n_pad = w.shape
    assert kw == k_pad and b.shape == (1, n_pad)

    cap = _vmem_capacity_bytes()
    budget = int(cap * 0.70)       # tile-selection budget (leave headroom)
    vmem_limit = int(cap * 0.85)

    if force_tiles is not None:
        tk, tn = force_tiles
    else:
        tk, tn = _select_tiles(R, k_pad, n_pad, budget)
    k_steps = k_pad // tk
    n_steps = n_pad // tn

    cost = pl.CostEstimate(
        flops=2 * R * k_pad * n_pad,
        transcendentals=R * n_pad if apply_tanh else 0,
        bytes_accessed=(k_pad * n_pad + R * k_pad + R * n_pad) * 2 + n_pad * 4,
    )

    if k_steps == 1:
        # Single reduction step: no accumulator scratch, no init/epilogue gates.
        kernel = functools.partial(_linear_full_k_kernel, apply_tanh=apply_tanh)
        grid = (n_steps,)
        in_specs = [
            pl.BlockSpec((R, k_pad), lambda j: (0, 0)),     # resident activations
            pl.BlockSpec((k_pad, tn), lambda j: (0, j)),    # streamed weight slab
            pl.BlockSpec((1, tn), lambda j: (0, j)),        # bias tile
        ]
        out_specs = pl.BlockSpec((R, tn), lambda j: (0, j))
        scratch = []
        dims = ("parallel",)
        x_in = x
    else:
        # Reshape [R, K] -> [k_steps, R, TK] so the kernel uses a cheap
        # leading-axis dynamic index while the whole activation block stays
        # resident (fetched once, not once per (N, K) step).
        x_in = x.reshape(R, k_steps, tk).transpose(1, 0, 2)
        kernel = functools.partial(_linear_streamed_k_kernel,
                                   apply_tanh=apply_tanh)
        grid = (n_steps, k_steps)                           # reduction axis last
        in_specs = [
            pl.BlockSpec((k_steps, R, tk), lambda j, k: (0, 0, 0)),  # resident
            pl.BlockSpec((tk, tn), lambda j, k: (k, j)),             # weight tile
            pl.BlockSpec((1, tn), lambda j, k: (0, j)),              # bias tile
        ]
        out_specs = pl.BlockSpec((R, tn), lambda j, k: (0, j))
        scratch = [pltpu.VMEM((R, tn), jnp.float32)]        # f32 accumulator
        dims = ("parallel", "arbitrary")

    return pl.pallas_call(
        kernel,
        out_shape=jax.ShapeDtypeStruct((R, n_pad), out_dtype),
        grid_spec=pltpu.PrefetchScalarGridSpec(
            num_scalar_prefetch=0,
            grid=grid,
            in_specs=in_specs,
            out_specs=out_specs,
            scratch_shapes=scratch,
        ),
        compiler_params=pltpu.CompilerParams(
            dimension_semantics=dims,
            vmem_limit_bytes=vmem_limit,
        ),
        cost_estimate=cost,
    )(x_in, w, b)


# ---------------------------------------------------------------------------
# PrefixEncoder parameter prep (one-time) + forward
# ---------------------------------------------------------------------------

def prepare_prefix_encoder_params(raw, prefix_projection=True):
    """One-time parameter prep (NOT per forward call): pad every matrix to
    lane multiples and cast weights/embedding to bf16 so the hot path streams
    only the bf16 weight bytes (weights stored as [in, out], i.e. x @ W + b)."""
    emb = raw["embedding"]
    kv_size = emb.shape[1]
    kv_pad = _round_up(kv_size, 128)
    params = {
        "kv_size": kv_size,
        "embedding": _pad2d(emb, emb.shape[0], kv_pad).astype(jnp.bfloat16),
    }
    if not prefix_projection:
        return params
    hidden = raw["w1"].shape[1]
    h_pad = _round_up(hidden, 128)
    params.update(
        hidden=hidden,
        w1=_pad2d(raw["w1"], kv_pad, h_pad).astype(jnp.bfloat16),
        b1=_pad2d(raw["b1"].reshape(1, -1).astype(jnp.float32), 1, h_pad),
        w2=_pad2d(raw["w2"], h_pad, kv_pad).astype(jnp.bfloat16),
        b2=_pad2d(raw["b2"].reshape(1, -1).astype(jnp.float32), 1, kv_pad),
    )
    return params


def prefix_encoder_forward(prefix, params, prefix_projection=True):
    """Embedding gather (jnp.take glue) + two fused bias/tanh Pallas matmuls.

    Deliberate precision choice: bf16 activations/weights, f32 accumulation,
    f32 bias/tanh epilogue (standard bf16 TPU inference, not f32 torch)."""
    kv_size = params["kv_size"]
    tokens = jnp.take(params["embedding"], prefix, axis=0)   # [B, P, kv_pad] bf16
    if not prefix_projection:
        return tokens[..., :kv_size]

    B, P, kv_pad = tokens.shape
    R = B * P
    r_pad = _round_up(max(R, 16), 16)              # bf16 sublane packing
    x = _pad2d(tokens.reshape(R, kv_pad), r_pad, kv_pad)

    # Linear(kv_size -> hidden) + Tanh, then Linear(hidden -> kv_size).
    # Padded *columns* stay exactly zero through both layers (zero-padded
    # weights and biases); padded *rows* carry tanh(b1) but are sliced below.
    h = _tiled_linear(x, params["w1"], params["b1"], apply_tanh=True)
    y = _tiled_linear(h, params["w2"], params["b2"], apply_tanh=False)

    return y[:R, :kv_size].reshape(B, P, kv_size)


if __name__ == "__main__":
    # Small synthetic ChatGLM2 config:
    #   num_layers=2, kv_channels=8, multi_query_group_num=2,
    #   hidden_size=32, pre_seq_len=16, prefix_projection=True
    num_layers, kv_channels, mqg, hidden_size, pre_seq_len = 2, 8, 2, 32, 16
    kv_size = num_layers * kv_channels * mqg * 2   # = 64

    key = jax.random.PRNGKey(0)
    k_emb, k_w1, k_b1, k_w2, k_b2, k_tok = jax.random.split(key, 6)

    raw_params = {
        "embedding": jax.random.normal(k_emb, (pre_seq_len, kv_size), jnp.float32) * 0.5,
        "w1": jax.random.normal(k_w1, (kv_size, hidden_size), jnp.float32) * 0.2,
        "b1": jax.random.normal(k_b1, (hidden_size,), jnp.float32) * 0.2,
        "w2": jax.random.normal(k_w2, (hidden_size, kv_size), jnp.float32) * 0.2,
        "b2": jax.random.normal(k_b2, (kv_size,), jnp.float32) * 0.2,
    }
    params = prepare_prefix_encoder_params(raw_params)   # one-time prep (hoisted)

    B, P = 2, 8  # batch_size, prefix_length
    prefix = jax.random.randint(k_tok, (B, P), 0, pre_seq_len, dtype=jnp.int32)

    out = prefix_encoder_forward(prefix, params, prefix_projection=True)
    out = jax.block_until_ready(out)
    assert out.shape == (B, P, kv_size)

    # Pure-JAX reference on bf16-quantized inputs (matches kernel input precision).
    bf = lambda a: a.astype(jnp.bfloat16).astype(jnp.float32)
    ref_tokens = jnp.take(raw_params["embedding"], prefix, axis=0)
    ref = (jnp.tanh(bf(ref_tokens) @ bf(raw_params["w1"]) + raw_params["b1"])
           @ bf(raw_params["w2"]) + raw_params["b2"])
    max_err = jnp.max(jnp.abs(out.astype(jnp.float32) - ref))
    assert max_err < 5e-2, f"max abs err {max_err}"

    # Also exercise the streamed-K (multi-step reduction) kernel path that the
    # VMEM-aware tile selector falls back to when a full-K weight slab doesn't fit.
    kx, kw = jax.random.split(key)
    xs = (jax.random.normal(kx, (16, 256), jnp.float32) * 0.3).astype(jnp.bfloat16)
    ws = (jax.random.normal(kw, (256, 128), jnp.float32) * 0.1).astype(jnp.bfloat16)
    bs = jnp.zeros((1, 128), jnp.float32)
    ys = jax.block_until_ready(
        _tiled_linear(xs, ws, bs, apply_tanh=False, force_tiles=(128, 128)))
    ref_s = xs.astype(jnp.float32) @ ws.astype(jnp.float32)
    err_s = jnp.max(jnp.abs(ys.astype(jnp.float32) - ref_s))
    assert err_s < 5e-2, f"streamed-K max abs err {err_s}"

    print("KERNEL_OK")
</pallas_src>

<mosaic_0001>
module attributes {stable_mosaic.version = 11 : i64} {
  func.func @_linear_full_k_kernel(%arg0: i32, %arg1: memref<16x128xbf16, #tpu.memory_space<vmem>>, %arg2: memref<128x128xbf16, #tpu.memory_space<vmem>>, %arg3: memref<1x128xf32, #tpu.memory_space<vmem>>, %arg4: memref<16x128xbf16, #tpu.memory_space<vmem>>) attributes {dimension_semantics = [#tpu.dimension_semantics<parallel>], iteration_bounds = array<i64: 1>, scalar_prefetch = 0 : i64, scratch_operands = 0 : i64, tpu.core_type = #tpu.core_type<tc>, window_params = [{pipeline_mode = #tpu.pipeline_mode<synchronous>, transform_indices = @transform_0, window_bounds = array<i64: 16, 128>}, {transform_indices = @transform_1, window_bounds = array<i64: 128, 128>}, {transform_indices = @transform_2, window_bounds = array<i64: 1, 128>}, {transform_indices = @transform_3, window_bounds = array<i64: 16, 128>}]} {
    %c0 = arith.constant 0 : index
    %c0_0 = arith.constant 0 : index
    %0 = vector.load %arg1[%c0, %c0_0] : memref<16x128xbf16, #tpu.memory_space<vmem>>, vector<16x128xbf16>
    %c0_1 = arith.constant 0 : index
    %c0_2 = arith.constant 0 : index
    %1 = vector.load %arg2[%c0_1, %c0_2] : memref<128x128xbf16, #tpu.memory_space<vmem>>, vector<128x128xbf16>
    %cst = arith.constant dense<0.000000e+00> : vector<16x128xf32>
    %2 = tpu.matmul %0, %1, %cst {dimension_numbers = #tpu.dot_dimension_numbers<[1], [0], [0], [1], [0, 0, 1, 1], [], []>} : vector<16x128xbf16>, vector<128x128xbf16>, vector<16x128xf32> -> vector<16x128xf32>
    %c0_3 = arith.constant 0 : index
    %c0_4 = arith.constant 0 : index
    %3 = vector.load %arg3[%c0_3, %c0_4] : memref<1x128xf32, #tpu.memory_space<vmem>>, vector<1x128xf32>
    %4 = vector.broadcast %3 : vector<1x128xf32> to vector<16x128xf32>
    %5 = arith.addf %2, %4 : vector<16x128xf32>
    %6 = math.tanh %5 : vector<16x128xf32>
    %7 = arith.truncf %6 : vector<16x128xf32> to vector<16x128xbf16>
    %c0_5 = arith.constant 0 : index
    %c0_6 = arith.constant 0 : index
    %8 = vector.load %arg4[%c0_5, %c0_6] : memref<16x128xbf16, #tpu.memory_space<vmem>>, vector<16x128xbf16>
    tpu.vector_store %arg4[%c0_5, %c0_6], %7 {strides = array<i32>} : memref<16x128xbf16, #tpu.memory_space<vmem>>, vector<16x128xbf16>,
    return
  }
  func.func @transform_0(%arg0: i32) -> (i32, i32) {
    %c0_i32 = arith.constant 0 : i32
    %c0_i32_0 = arith.constant 0 : i32
    %c0_i32_1 = arith.constant 0 : i32
    return %c0_i32, %c0_i32_0 : i32, i32
  }
  func.func @transform_1(%arg0: i32) -> (i32, i32) {
    %c0_i32 = arith.constant 0 : i32
    %c0_i32_0 = arith.constant 0 : i32
    return %c0_i32, %arg0 : i32, i32
  }
  func.func @transform_2(%arg0: i32) -> (i32, i32) {
    %c0_i32 = arith.constant 0 : i32
    %c0_i32_0 = arith.constant 0 : i32
    return %c0_i32, %arg0 : i32, i32
  }
  func.func @transform_3(%arg0: i32) -> (i32, i32) {
    %c0_i32 = arith.constant 0 : i32
    %c0_i32_0 = arith.constant 0 : i32
    return %c0_i32, %arg0 : i32, i32
  }
}

</mosaic_0001>

<bundles_post_ra>
// kernel: tpu_custom_call.1
= control target key start
LH: loop header
LB: loop body
LE: loop exit
PB: predicated region body
PF: predicated region fallthrough
CT: control target
= control target key end

     0   :  { %8 = vsyncpa [#allocation3], 0  ;;  %s409_s0 = inlined_call_operand.hbm [shape: bf16[16,128], index: 0, kind: input, shape index: {}]   ;;  %s410_s1 = inlined_call_operand.hbm [shape: bf16[128,128], index: 1, kind: input, shape index: {}]   ;;  %s411_s2 = inlined_call_operand.vmem [shape: f32[1,128], index: 2, kind: input, shape index: {}]   ;;  %s412_s3 = inlined_call_operand.hbm [shape: bf16[16,128], index: 3, kind: output, shape index: {}]  }
   0x1   :  { %9 = vsyncpa [#allocation6], 0 }
   0x2   :  { %10 = vsyncpa [#allocation4], 0  ;;  %s334_s12 = smov [#allocation2]   ;;  %s262_s16 = scalar_lea.hbm %s409_s0, 128 }
   0x3   :  { %s16_s13 = sshll.u32 %s334_s12, 4  ;;  %p263_p0 = scmp.ne.s32.totalorder %s409_s0, %s262_s16  ;;  %s17_s13 = int_to_ptr.vmem [resolvable:$true] %s16_s13 }
   0x4   :  { %p266_p1 = scmp.lt.u32.totalorder %s262_s16, %s409_s0 }
   0x6   :  { %p268_p2 = pnand %p266_p1, %p263_p0 }
   0x8   :  { %271 = shalt.err (!%p268_p2)
}
   0x9   :  { %s272_s21 = scalar_lea.vmem %s17_s13, 128  ;;  %p277_p4 = scmp.lt.s32.totalorder %s17_s13, %s17_s13 }
   0xa   :  { %p273_p3 = scmp.ne.s32.totalorder %s17_s13, %s272_s21  ;;  %p278_p5 = scmp.lt.s32.totalorder %s272_s21, %s272_s21 }
   0xc   :  { %p279_p6 = por %p278_p5, %p277_p4 }
   0xe   :  { %p280_p7 = pnand %p279_p6, %p273_p3 }
  0x10   :  { %283 = shalt.err (!%p280_p7)
}
  0x11   :  { %s335_s22 = smov 64   ;;  %s336_s23 = smov 4  }
  0x12   :  { %22 = dma.hbm_to_vmem [thread:$0]  %s409_s0, 128, %s17_s13, [#allocation3], %s335_s22, %s335_s22, %s336_s23  }
  0x13   :  { %s337_s26 = smov [#allocation5]   ;;  %s284_s30 = scalar_lea.hbm %s410_s1, 1024 }
  0x14   :  { %s28_s27 = sshll.u32 %s337_s26, 4  ;;  %p285_p8 = scmp.ne.s32.totalorder %s410_s1, %s284_s30  ;;  %s29_s27 = int_to_ptr.vmem [resolvable:$true] %s28_s27 }
  0x15   :  { %p288_p9 = scmp.lt.u32.totalorder %s284_s30, %s410_s1 }
  0x17   :  { %p290_p10 = pnand %p288_p9, %p285_p8 }
  0x19   :  { %293 = shalt.err (!%p290_p10)
}
  0x1a   :  { %s294_s8 = scalar_lea.vmem %s29_s27, 1024  ;;  %p299_p12 = scmp.lt.s32.totalorder %s29_s27, %s29_s27 }
  0x1b   :  { %p295_p11 = scmp.ne.s32.totalorder %s29_s27, %s294_s8  ;;  %p300_p13 = scmp.lt.s32.totalorder %s294_s8, %s294_s8 }
  0x1d   :  { %p301_p0 = por %p300_p13, %p299_p12 }
  0x1f   :  { %p302_p1 = pnand %p301_p0, %p295_p11 }
  0x21   :  { %305 = shalt.err (!%p302_p1)
}
  0x22   :  { %34 = dma.hbm_to_vmem [thread:$0]  %s410_s1, 1024, %s29_s27, [#allocation6], %s335_s22, %s335_s22, %s336_s23  }
  0x23   :  { %328 = dma.done.wait [#allocation3], 128  }
  0x24   :  { %329 = vsyncadd [#allocation3], 4294967168 }
  0x25   :  { %330 = dma.done.wait [#allocation6], 1024  }
  0x26   :  { %331 = vsyncadd [#allocation6], 4294966272  ;;  %v338_v0 = vmov 0.0   ;;  %vm339_vm0 = vmmov 0   ;;  %v249_v1 = vld [vmem:[#allocation5] sm:$0xff]   ;;  %v250_v2 = vld [vmem:[#allocation5 + $0x8] sm:$0xff]  }
  0x27   :  { %222 = vmatprep.subr.bf16.mxu0 %v338_v0  ;;  %238 = vmatprep.mubr.msk.bf16.mxu0 %vm339_vm0, %v338_v0  ;;  %v251_v3 = vld [vmem:[#allocation5 + $0x10] sm:$0xff]   ;;  %v252_v4 = vld [vmem:[#allocation5 + $0x18] sm:$0xff]   ;;  %v253_v5 = vld [vmem:[#allocation5 + $0x20] sm:$0xff]   ;;  %s340_s11 = smov [#allocation7]  }
  0x28   :  { %223 = vmatpush3.bf16.msra.mxu0 %v249_v1  ;;  %v254_v6 = vld [vmem:[#allocation5 + $0x28] sm:$0xff]   ;;  %v255_v7 = vld [vmem:[#allocation5 + $0x30] sm:$0xff]   ;;  %v256_v8 = vld [vmem:[#allocation5 + $0x38] sm:$0xff]   ;;  %s181_s12 = sshll.u32 %s340_s11, 4  ;;  %s182_s12 = int_to_ptr.vmem [resolvable:$true] %s181_s12 }
  0x29   :  { %224 = vmatprep.subr.bf16.mxu0 %v338_v0  ;;  %v257_v9 = vld [vmem:[#allocation2] sm:$0xff]   ;;  %s306_s13 = scalar_lea.vmem %s182_s12, 128  ;;  %p311_p3 = scmp.lt.s32.totalorder %s182_s12, %s182_s12 }
  0x2a   :  { %v194_v10 = vld [vmem:[%s411_s2] ss:$0 sm:$0xff]  ;;  %p307_p2 = scmp.ne.s32.totalorder %s182_s12, %s306_s13  ;;  %p312_p4 = scmp.lt.s32.totalorder %s306_s13, %s306_s13 }
  0x2c   :  { %225 = vmatpush3.bf16.msra.mxu0 %v250_v2  ;;  %p313_p5 = por %p312_p4, %p311_p3 }
  0x2d   :  { %226 = vmatprep.subr.bf16.mxu0 %v338_v0 }
  0x2e   :  { %p314_p6 = pnand %p313_p5, %p307_p2 }
  0x30   :  { %227 = vmatpush3.bf16.msra.mxu0 %v251_v3 }
  0x31   :  { %228 = vmatprep.subr.bf16.mxu0 %v338_v0 }
  0x34   :  { %229 = vmatpush3.bf16.msra.mxu0 %v252_v4 }
  0x35   :  { %230 = vmatprep.subr.bf16.mxu0 %v338_v0 }
  0x38   :  { %231 = vmatpush3.bf16.msra.mxu0 %v253_v5 }
  0x39   :  { %232 = vmatprep.subr.bf16.mxu0 %v338_v0 }
  0x3c   :  { %233 = vmatpush3.bf16.msra.mxu0 %v254_v6 }
  0x3d   :  { %234 = vmatprep.subr.bf16.mxu0 %v338_v0 }
  0x40   :  { %235 = vmatpush3.bf16.msra.mxu0 %v255_v7 }
  0x41   :  { %236 = vmatprep.subr.bf16.mxu0 %v338_v0 }
  0x44   :  { %237 = vmatpush3.bf16.msra.mxu0 %v256_v8 }
  0x47   :  { %239 = vmatmul.mubr.bf16.vlgmr.msra.gmra.mrb[0].mxu0 %v257_v9 }
 0x11a   :  { %v157_v11 = vpop.f32.mrb[0].mxu0 }
 0x11b   :  { %v158_v12 = vadd.f32 %v194_v10, %v157_v11  ;;  %v240_v13 = vpop.f32.mrb[1].mxu0 }
 0x11c   :  { %v160_v14 = vpop.f32.mrb[2].mxu0 }
 0x11d   :  { %v161_v15 = vadd.f32 %v194_v10, %v160_v14  ;;  %v241_v16 = vpop.f32.mrb[3].mxu0  ;;  %258 = vtanh.f32 %v158_v12 }
 0x11f   :  { %260 = vtanh.f32 %v161_v15 }
 0x127   :  { %v259_v17 = vpop.eup %258 }
 0x129   :  { %v261_v18 = vpop.eup %260 }
 0x12a   :  { %v211_v19 = vpack.c.bf16 %v261_v18, %v259_v17 }
 0x12c   :  { %212 = vst [vmem:[#allocation7] sm:$0xff] %v211_v19  }
 0x12d   :  { %317 = shalt.err (!%p314_p6)
}
 0x12e   :  { %s318_s15 = scalar_lea.hbm %s412_s3, 128 }
 0x12f   :  { %p319_p7 = scmp.ne.s32.totalorder %s412_s3, %s318_s15  ;;  %p322_p8 = scmp.lt.u32.totalorder %s318_s15, %s412_s3 }
 0x131   :  { %p324_p9 = pnand %p322_p8, %p319_p7 }
 0x133   :  { %327 = shalt.err (!%p324_p9)
}
 0x134   :  { %187 = dma.vmem_to_hbm [thread:$0]  %s182_s12, 128, %s412_s3, [#allocation4], %s335_s22, %s335_s22, %s336_s23  }
 0x135   :  { %332 = dma.done.wait [#allocation4], 128  }
 0x136   :  { %333 = vsyncadd [#allocation4], 4294967168 }
 0x137   :  { %191 = vsyncpa [#allocation3], 1 }
 0x138   :  { %192 = vsyncpa [#allocation6], 1 }
 0x139   :  { %193 = vsyncpa [#allocation4], 1 }

</bundles_post_ra>
